<compile_context>
chip_gen: v7x
topology: tpu7x:2x2x1
jax: 0.10.0
libtpu: 0.0.40
codegen_flags: <defaults>
</compile_context>

<pallas_src>
import jax
import jax.numpy as jnp
from jax import lax
from jax.experimental import pallas as pl
from jax.experimental.pallas import tpu as pltpu


# ---------------------------------------------------------------------------
# Kernels
# ---------------------------------------------------------------------------
def _spectral_kernel(x_ref, w_ref, o_ref):
    """out[m,b,:] = [xr|xi][m,b,:] @ [[wr,wi],[-wi,wr]][m]  (no FiLM)."""
    o_ref[...] = jnp.einsum(
        'mbk,mkn->mbn', x_ref[...], w_ref[...],
        preferred_element_type=jnp.float32).astype(o_ref.dtype)


def _spectral_film_kernel(x_ref, w_ref, film_ref, o_ref):
    """Same as above, fused with the pre-computed FiLM scale (film is already
    duplicated over the [real | imag] halves -> (bm, B, 2*Cout))."""
    out = jnp.einsum(
        'mbk,mkn->mbn', x_ref[...], w_ref[...],
        preferred_element_type=jnp.float32)
    o_ref[...] = (out * film_ref[...]).astype(o_ref.dtype)


# ---------------------------------------------------------------------------
# pallas_call wrapper
# ---------------------------------------------------------------------------
def _spectral_mul(x_pk, w_pk, film, block_m, vmem_limit):
    M_pad, B, K = x_pk.shape          # K  = 2*Cin
    N2 = w_pk.shape[2]                # N2 = 2*Cout
    grid = (M_pad // block_m,)

    spec_x = pl.BlockSpec((block_m, B, K), lambda m: (m, 0, 0))
    spec_w = pl.BlockSpec((block_m, K, N2), lambda m: (m, 0, 0))
    spec_o = pl.BlockSpec((block_m, B, N2), lambda m: (m, 0, 0))

    params = pltpu.CompilerParams(
        dimension_semantics=("parallel",),
        vmem_limit_bytes=int(vmem_limit))
    out_shape = jax.ShapeDtypeStruct((M_pad, B, N2), jnp.float32)

    if film is None:
        return pl.pallas_call(
            _spectral_kernel,
            out_shape=out_shape,
            grid=grid,
            in_specs=[spec_x, spec_w],
            out_specs=spec_o,
            compiler_params=params,
        )(x_pk, w_pk)

    spec_f = pl.BlockSpec((block_m, B, N2), lambda m: (m, 0, 0))
    return pl.pallas_call(
        _spectral_film_kernel,
        out_shape=out_shape,
        grid=grid,
        in_specs=[spec_x, spec_w, spec_f],
        out_specs=spec_o,
        compiler_params=params,
    )(x_pk, w_pk, film)


# ---------------------------------------------------------------------------
# Block-size / VMEM-budget selection (per TPU generation)
# ---------------------------------------------------------------------------
def _vmem_budget_bytes():
    try:
        phys = int(pltpu.get_tpu_info().vmem_capacity_bytes)
    except Exception:
        phys = 64 << 20                 # conservative default = v7x physical
    return phys // 2                    # ~50% of physical, leaves headroom


def _choose_block_m(modes1, per_mode_bytes, budget):
    # Double-buffered pipelining of every blocked operand + compiler scratch.
    usable = max(budget - (4 << 20), 1 << 20)
    max_bm = max(1, usable // (2 * per_mode_bytes))
    bm = min(modes1, max_bm)
    if modes1 > 8:
        # Keep the grid >= 2 steps so ("parallel",) can use both v7x TCs.
        bm = min(bm, pl.cdiv(modes1, 2))
    return int(max(1, bm))


# ---------------------------------------------------------------------------
# Forward pass
# ---------------------------------------------------------------------------
def spectral_conv1d(x, wr, wi, modes1, p=None, w_feat=None, b_feat=None,
                    transform_mode=1, compute_dtype=jnp.bfloat16,
                    block_m=None):
    """Forward pass of SpectralConv1d.

    x:        (B, in_channels, N) float32
    wr, wi:   (in_channels, out_channels, modes1) float32 (real/imag weights1)
    p:        optional (B, feature_transform_dim) float32 for FiLM
    returns:  (B, out_channels, N) float32
    """
    B, Cin, N = x.shape
    Cout = wr.shape[1]
    ft_size = N // 2 + 1

    # Truncated rFFT (XLA op; no Pallas TPU FFT primitive).
    x_ft = jnp.fft.rfft(x)[:, :, :modes1]                  # (B, Cin, modes1)
    xr = jnp.real(x_ft).astype(jnp.float32)
    xi = jnp.imag(x_ft).astype(jnp.float32)

    # Stacked real/imag layout: modes = matmul batch dim, channels on lanes.
    x_pk = jnp.concatenate(
        [jnp.transpose(xr, (2, 0, 1)), jnp.transpose(xi, (2, 0, 1))],
        axis=-1).astype(compute_dtype)                      # (m, B, 2*Cin)

    wr_t = jnp.transpose(wr, (2, 0, 1)).astype(jnp.float32)  # (m, Cin, Cout)
    wi_t = jnp.transpose(wi, (2, 0, 1)).astype(jnp.float32)
    w_pk = jnp.concatenate(
        [jnp.concatenate([wr_t, wi_t], axis=-1),
         jnp.concatenate([-wi_t, wr_t], axis=-1)],
        axis=1).astype(compute_dtype)                       # (m, 2*Cin, 2*Cout)

    # FiLM scale as one XLA GEMM, hoisted out of the kernel.
    film = None
    if p is not None:
        flat = (p.astype(jnp.float32) @ w_feat.astype(jnp.float32).T
                + b_feat.astype(jnp.float32))               # (B, Cout*modes1)
        film = flat.reshape(B, Cout, modes1)                # o*modes1 + m order
        if transform_mode == 0:
            film = film + 1.0                               # act * (1 + FiLM)
        film = jnp.transpose(film, (2, 0, 1))               # (m, B, Cout)
        film = jnp.concatenate([film, film], axis=-1)       # (m, B, 2*Cout)

    # Per-generation block size / VMEM budget.
    itemsize = jnp.dtype(compute_dtype).itemsize
    per_mode_bytes = (B * 2 * Cin * itemsize                # x block
                      + 2 * Cin * 2 * Cout * itemsize       # w block
                      + B * 2 * Cout * 4)                   # f32 output block
    if film is not None:
        per_mode_bytes += B * 2 * Cout * 4                  # film block
    budget = _vmem_budget_bytes()
    if block_m is None:
        block_m = _choose_block_m(modes1, per_mode_bytes, budget)

    num_blocks = int(pl.cdiv(modes1, block_m))
    M_pad = num_blocks * block_m
    pad = M_pad - modes1
    if pad:
        pad3 = ((0, pad), (0, 0), (0, 0))
        x_pk = jnp.pad(x_pk, pad3)
        w_pk = jnp.pad(w_pk, pad3)
        if film is not None:
            film = jnp.pad(film, pad3)

    out = _spectral_mul(x_pk, w_pk, film, block_m, budget)  # (M_pad, B, 2*Cout)

    # (modes, B, Cout) -> (B, Cout, modes); single zero-pad, then inverse rFFT.
    out_r = jnp.transpose(out[:modes1, :, :Cout], (1, 2, 0))
    out_i = jnp.transpose(out[:modes1, :, Cout:], (1, 2, 0))
    out_ft = lax.complex(out_r, out_i)
    out_ft = jnp.pad(out_ft, ((0, 0), (0, 0), (0, ft_size - modes1)))
    return jnp.fft.irfft(out_ft, n=N).astype(jnp.float32)


# ---------------------------------------------------------------------------
# Pure-JAX reference mirroring the PyTorch forward
# ---------------------------------------------------------------------------
def _reference(x, wr, wi, modes1, p=None, w_feat=None, b_feat=None,
               transform_mode=1):
    B, Cin, N = x.shape
    Cout = wr.shape[1]
    ft_size = N // 2 + 1
    w = wr + 1j * wi
    x_ft = jnp.fft.rfft(x)
    out = jnp.einsum('bix,iox->box', x_ft[:, :, :modes1], w.astype(jnp.complex64))
    out_ft = jnp.zeros((B, Cout, ft_size), jnp.complex64).at[:, :, :modes1].set(out)
    if p is not None:
        film_w = (p @ w_feat.T + b_feat).reshape(B, Cout, modes1)
        film = jnp.ones((B, Cout, ft_size), jnp.float32)
        if transform_mode == 0:
            film = film.at[:, :, :modes1].add(film_w)
        else:
            film = film.at[:, :, :modes1].set(film_w)
        out_ft = out_ft * film
    return jnp.fft.irfft(out_ft, n=N)


if __name__ == "__main__":
    key = jax.random.PRNGKey(0)
    k_x, k_wr, k_wi, k_p, k_lw, k_lb = jax.random.split(key, 6)

    # Small shapes consistent with the module.
    B, Cin, Cout, N = 2, 4, 4, 16
    modes1 = 8                       # <= N//2 + 1
    feat_dim = 6

    scale = 1.0 / (Cin * Cout)
    wr = scale * jax.random.uniform(k_wr, (Cin, Cout, modes1), jnp.float32)
    wi = scale * jax.random.uniform(k_wi, (Cin, Cout, modes1), jnp.float32)
    w_feat = 0.1 * jax.random.uniform(k_lw, (Cout * modes1, feat_dim),
                                      jnp.float32, minval=-1.0, maxval=1.0)
    b_feat = 0.1 * jax.random.uniform(k_lb, (Cout * modes1,), jnp.float32,
                                      minval=-1.0, maxval=1.0)

    x = jax.random.normal(k_x, (B, Cin, N), jnp.float32)
    p = jax.random.normal(k_p, (B, feat_dim), jnp.float32)

    # Exercise FiLM modes 0/1, the p=None path (both transform modes), and
    # both compute dtypes (f32 for tight-tolerance check, bf16 = MXU path).
    configs = [(1, True), (0, True), (1, False), (0, False)]
    for compute_dtype, atol, rtol in ((jnp.float32, 1e-4, 1e-4),
                                      (jnp.bfloat16, 1e-2, 5e-2)):
        for tm, use_p in configs:
            pp = p if use_p else None
            out = spectral_conv1d(x, wr, wi, modes1, p=pp, w_feat=w_feat,
                                  b_feat=b_feat, transform_mode=tm,
                                  compute_dtype=compute_dtype)
            out = jax.block_until_ready(out)
            ref = _reference(x, wr, wi, modes1, p=pp, w_feat=w_feat,
                             b_feat=b_feat, transform_mode=tm)
            assert out.shape == (B, Cout, N)
            assert jnp.allclose(out, ref, atol=atol, rtol=rtol), (
                f"mismatch vs reference (transform_mode={tm}, "
                f"p={'yes' if use_p else 'None'}, "
                f"dtype={jnp.dtype(compute_dtype).name})")

    print("KERNEL_OK")
</pallas_src>

<mosaic_0001>
module attributes {stable_mosaic.version = 11 : i64} {
  func.func @_spectral_film_kernel(%arg0: i32, %arg1: memref<8x2x8xf32, #tpu.memory_space<vmem>>, %arg2: memref<8x8x8xf32, #tpu.memory_space<vmem>>, %arg3: memref<8x2x8xf32, #tpu.memory_space<vmem>>, %arg4: memref<8x2x8xf32, #tpu.memory_space<vmem>>) attributes {dimension_semantics = [#tpu.dimension_semantics<parallel>], iteration_bounds = array<i64: 1>, scalar_prefetch = 0 : i64, scratch_operands = 0 : i64, tpu.core_type = #tpu.core_type<tc>, window_params = [{transform_indices = @transform_0, window_bounds = array<i64: 8, 2, 8>}, {transform_indices = @transform_1, window_bounds = array<i64: 8, 8, 8>}, {transform_indices = @transform_2, window_bounds = array<i64: 8, 2, 8>}, {transform_indices = @transform_3, window_bounds = array<i64: 8, 2, 8>}]} {
    %c0 = arith.constant 0 : index
    %c0_0 = arith.constant 0 : index
    %c0_1 = arith.constant 0 : index
    %0 = vector.load %arg1[%c0, %c0_0, %c0_1] : memref<8x2x8xf32, #tpu.memory_space<vmem>>, vector<8x2x8xf32>
    %c0_2 = arith.constant 0 : index
    %c0_3 = arith.constant 0 : index
    %c0_4 = arith.constant 0 : index
    %1 = vector.load %arg2[%c0_2, %c0_3, %c0_4] : memref<8x8x8xf32, #tpu.memory_space<vmem>>, vector<8x8x8xf32>
    "tpu.trace_start"() <{level = 10 : i32, message = "mbk,mkn->mbn"}> : () -> ()
    %cst = arith.constant dense<0.000000e+00> : vector<8x2x8xf32>
    %2 = tpu.matmul %0, %1, %cst {dimension_numbers = #tpu.dot_dimension_numbers<[2], [1], [1], [2], [0, 0, 0, 1, 1, 2], [0], [0]>} : vector<8x2x8xf32>, vector<8x8x8xf32>, vector<8x2x8xf32> -> vector<8x2x8xf32>
    "tpu.trace_stop"() : () -> ()
    %c0_5 = arith.constant 0 : index
    %c0_6 = arith.constant 0 : index
    %c0_7 = arith.constant 0 : index
    %3 = vector.load %arg3[%c0_5, %c0_6, %c0_7] : memref<8x2x8xf32, #tpu.memory_space<vmem>>, vector<8x2x8xf32>
    %4 = arith.mulf %2, %3 : vector<8x2x8xf32>
    %c0_8 = arith.constant 0 : index
    %c0_9 = arith.constant 0 : index
    %c0_10 = arith.constant 0 : index
    %5 = vector.load %arg4[%c0_8, %c0_9, %c0_10] : memref<8x2x8xf32, #tpu.memory_space<vmem>>, vector<8x2x8xf32>
    tpu.vector_store %arg4[%c0_8, %c0_9, %c0_10], %4 {strides = array<i32>} : memref<8x2x8xf32, #tpu.memory_space<vmem>>, vector<8x2x8xf32>,
    return
  }
  func.func @transform_0(%arg0: i32) -> (i32, i32, i32) {
    %c0_i32 = arith.constant 0 : i32
    %c0_i32_0 = arith.constant 0 : i32
    %c0_i32_1 = arith.constant 0 : i32
    return %arg0, %c0_i32, %c0_i32_0 : i32, i32, i32
  }
  func.func @transform_1(%arg0: i32) -> (i32, i32, i32) {
    %c0_i32 = arith.constant 0 : i32
    %c0_i32_0 = arith.constant 0 : i32
    %c0_i32_1 = arith.constant 0 : i32
    return %arg0, %c0_i32, %c0_i32_0 : i32, i32, i32
  }
  func.func @transform_2(%arg0: i32) -> (i32, i32, i32) {
    %c0_i32 = arith.constant 0 : i32
    %c0_i32_0 = arith.constant 0 : i32
    %c0_i32_1 = arith.constant 0 : i32
    return %arg0, %c0_i32, %c0_i32_0 : i32, i32, i32
  }
  func.func @transform_3(%arg0: i32) -> (i32, i32, i32) {
    %c0_i32 = arith.constant 0 : i32
    %c0_i32_0 = arith.constant 0 : i32
    %c0_i32_1 = arith.constant 0 : i32
    return %arg0, %c0_i32, %c0_i32_0 : i32, i32, i32
  }
}

</mosaic_0001>

<bundles_post_ra>
// kernel: tpu_custom_call.1
= control target key start
LH: loop header
LB: loop body
LE: loop exit
PB: predicated region body
PF: predicated region fallthrough
CT: control target
= control target key end

     0   :  { %8 = vsyncpa [#allocation3], 0  ;;  %s979_s0 = inlined_call_operand.hbm [shape: f32[8,2,8], index: 0, kind: input, shape index: {}]   ;;  %s980_s1 = inlined_call_operand.hbm [shape: f32[8,8,8], index: 1, kind: input, shape index: {}]   ;;  %s981_s2 = inlined_call_operand.hbm [shape: f32[8,2,8], index: 2, kind: input, shape index: {}]   ;;  %s982_s3 = inlined_call_operand.hbm [shape: f32[8,2,8], index: 3, kind: output, shape index: {}]  }
   0x1   :  { %9 = vsyncpa [#allocation6], 0 }
   0x2   :  { %10 = vsyncpa [#allocation4], 0  ;;  %s868_s12 = smov [#allocation5]   ;;  %s774_s16 = scalar_lea.hbm %s980_s1, 1024 }
   0x3   :  { %s28_s13 = sshll.u32 %s868_s12, 4  ;;  %p775_p0 = scmp.ne.s32.totalorder %s980_s1, %s774_s16  ;;  %s29_s13 = int_to_ptr.vmem [resolvable:$true] %s28_s13 }
   0x4   :  { %p778_p1 = scmp.lt.u32.totalorder %s774_s16, %s980_s1 }
   0x6   :  { %p780_p2 = pnand %p778_p1, %p775_p0 }
   0x8   :  { %783 = shalt.err (!%p780_p2)
}
   0x9   :  { %s784_s21 = scalar_lea.vmem %s29_s13, 1024  ;;  %p789_p4 = scmp.lt.s32.totalorder %s29_s13, %s29_s13 }
   0xa   :  { %p785_p3 = scmp.ne.s32.totalorder %s29_s13, %s784_s21  ;;  %p790_p5 = scmp.lt.s32.totalorder %s784_s21, %s784_s21 }
   0xc   :  { %p791_p6 = por %p790_p5, %p789_p4 }
   0xe   :  { %p792_p7 = pnand %p791_p6, %p785_p3 }
  0x10   :  { %795 = shalt.err (!%p792_p7)
}
  0x11   :  { %s869_s22 = smov 128   ;;  %s870_s23 = smov 8  }
  0x12   :  { %34 = dma.hbm_to_vmem [thread:$0]  %s980_s1, 1024, %s29_s13, [#allocation6], %s869_s22, %s869_s22, %s870_s23  }
  0x13   :  { %s871_s26 = smov [#allocation2]   ;;  %s796_s30 = scalar_lea.hbm %s979_s0, 256 }
  0x14   :  { %s16_s27 = sshll.u32 %s871_s26, 4  ;;  %p797_p8 = scmp.ne.s32.totalorder %s979_s0, %s796_s30  ;;  %s17_s27 = int_to_ptr.vmem [resolvable:$true] %s16_s27 }
  0x15   :  { %p800_p9 = scmp.lt.u32.totalorder %s796_s30, %s979_s0 }
  0x17   :  { %p802_p10 = pnand %p800_p9, %p797_p8 }
  0x19   :  { %805 = shalt.err (!%p802_p10)
}
  0x1a   :  { %s806_s8 = scalar_lea.vmem %s17_s27, 256  ;;  %p811_p12 = scmp.lt.s32.totalorder %s17_s27, %s17_s27 }
  0x1b   :  { %p807_p11 = scmp.ne.s32.totalorder %s17_s27, %s806_s8  ;;  %p812_p13 = scmp.lt.s32.totalorder %s806_s8, %s806_s8 }
  0x1d   :  { %p813_p0 = por %p812_p13, %p811_p12 }
  0x1f   :  { %p814_p1 = pnand %p813_p0, %p807_p11 }
  0x21   :  { %817 = shalt.err (!%p814_p1)
}
  0x22   :  { %s872_s1 = smov 32   ;;  %s873_s9 = smov 2  }
  0x23   :  { %22 = dma.hbm_to_vmem [thread:$0]  %s979_s0, 256, %s17_s27, [#allocation3], %s872_s1, %s872_s1, %s873_s9  }
  0x24   :  { %s874_s12 = smov [#allocation7]   ;;  %s818_s16 = scalar_lea.hbm %s981_s2, 256 }
  0x25   :  { %s40_s13 = sshll.u32 %s874_s12, 4  ;;  %p819_p2 = scmp.ne.s32.totalorder %s981_s2, %s818_s16  ;;  %s41_s13 = int_to_ptr.vmem [resolvable:$true] %s40_s13 }
  0x26   :  { %p822_p3 = scmp.lt.u32.totalorder %s818_s16, %s981_s2 }
  0x28   :  { %p824_p4 = pnand %p822_p3, %p819_p2 }
  0x2a   :  { %827 = shalt.err (!%p824_p4)
}
  0x2b   :  { %s828_s21 = scalar_lea.vmem %s41_s13, 256  ;;  %p833_p6 = scmp.lt.s32.totalorder %s41_s13, %s41_s13 }
  0x2c   :  { %p829_p5 = scmp.ne.s32.totalorder %s41_s13, %s828_s21  ;;  %p834_p7 = scmp.lt.s32.totalorder %s828_s21, %s828_s21 }
  0x2e   :  { %p835_p8 = por %p834_p7, %p833_p6 }
  0x30   :  { %p836_p9 = pnand %p835_p8, %p829_p5 }
  0x32   :  { %839 = shalt.err (!%p836_p9)
}
  0x33   :  { %46 = dma.hbm_to_vmem [thread:$0]  %s981_s2, 256, %s41_s13, [#allocation6], %s872_s1, %s872_s1, %s873_s9  }
  0x34   :  { %862 = dma.done.wait [#allocation3], 256  }
  0x35   :  { %863 = vsyncadd [#allocation3], 4294967040 }
  0x36   :  { %864 = dma.done.wait [#allocation6], 1280  }
  0x37   :  { %865 = vsyncadd [#allocation6], 4294966016  ;;  %v875_v0 = vmov 0.0   ;;  %vm876_vm0 = vmmov 0   ;;  %vm72_vm1 = vcmask 64512   ;;  %v64_v1 = vld [vmem:[#allocation5] sm:$0xff] }
  0x38   :  { %724 = vmatprep.subr.mxu0 %v875_v0  ;;  %729 = vmatprep.subr.mxu1 %v875_v0  ;;  %v65_v2 = vld [vmem:[#allocation5 + $0x8] sm:$0xff]  ;;  %v56_v3 = vld [vmem:[#allocation2] sm:$0x3]  ;;  %v57_v4 = vld [vmem:[#allocation2 + $0x2] sm:$0x3]  ;;  %vm673_vm2 = vcmask 58368  }
  0x39   :  { %726 = vmatprep.mubr.msk.f32.mxu0 %vm876_vm0, %v875_v0  ;;  %731 = vmatprep.mubr.msk.f32.mxu1 %vm876_vm0, %v875_v0  ;;  %v66_v5 = vld [vmem:[#allocation5 + $0x10] sm:$0xff]  ;;  %v67_v6 = vld [vmem:[#allocation5 + $0x18] sm:$0xff]  ;;  %v68_v9 = vld [vmem:[#allocation5 + $0x20] sm:$0xff]  ;;  %s877_s2 = smov [#allocation8]  }
  0x3a   :  { %725 = vmatpush3.msra.mxu0 %v64_v1  ;;  %730 = vmatpush3.msra.mxu1 %v65_v2  ;;  %v58_v7 = vld [vmem:[#allocation2 + $0x4] sm:$0x3]  ;;  %v59_v8 = vld [vmem:[#allocation2 + $0x6] sm:$0x3]  ;;  %v69_v10 = vld [vmem:[#allocation5 + $0x28] sm:$0xff]  ;;  %s687_s23 = sshll.u32 %s877_s2, 4  ;;  %s688_s23 = int_to_ptr.vmem [resolvable:$true] %s687_s23 }
  0x3b   :  { %727 = vmatmul.mubr.msk.f32.vlgmr.msra.gmra.mrb[0].mxu0 %vm72_vm1, %v56_v3  ;;  %732 = vmatmul.mubr.msk.f32.vlgmr.msra.gmra.mrb[0].mxu1 %vm72_vm1, %v57_v4  ;;  %v60_v11 = vld [vmem:[#allocation2 + $0x8] sm:$0x3]  ;;  %v61_v12 = vld [vmem:[#allocation2 + $0xa] sm:$0x3]  ;;  %v70_v13 = vld [vmem:[#allocation5 + $0x30] sm:$0xff]  ;;  %s840_s24 = scalar_lea.vmem %s688_s23, 256  ;;  %p845_p11 = scmp.lt.s32.totalorder %s688_s23, %s688_s23 }
  0x3c   :  { %734 = vmatprep.subr.mxu0 %v875_v0  ;;  %739 = vmatprep.subr.mxu1 %v875_v0  ;;  %v71_v14 = vld [vmem:[#allocation5 + $0x38] sm:$0xff]  ;;  %v657_v17 = vld [vmem:[#allocation7] sm:$0x3]  ;;  %v658_v18 = vld [vmem:[#allocation7 + $0x2] sm:$0x3]  ;;  %p841_p10 = scmp.ne.s32.totalorder %s688_s23, %s840_s24  ;;  %p846_p12 = scmp.lt.s32.totalorder %s840_s24, %s840_s24 }
  0x3d   :  { %735 = vmatpush3.msra.mxu0 %v66_v5  ;;  %740 = vmatpush3.msra.mxu1 %v67_v6  ;;  %v62_v15 = vld [vmem:[#allocation2 + $0xc] sm:$0x3]  ;;  %v63_v16 = vld [vmem:[#allocation2 + $0xe] sm:$0x3]  ;;  %v659_v25 = vld [vmem:[#allocation7 + $0x4] sm:$0x3] }
  0x3e   :  { %736 = vmatprep.mubr.msk.f32.mxu0 %vm876_vm0, %v875_v0  ;;  %741 = vmatprep.mubr.msk.f32.mxu1 %vm876_vm0, %v875_v0  ;;  %v660_v26 = vld [vmem:[#allocation7 + $0x6] sm:$0x3]  ;;  %v661_v33 = vld [vmem:[#allocation7 + $0x8] sm:$0x3]  ;;  %v662_v34 = vld [vmem:[#allocation7 + $0xa] sm:$0x3]  ;;  %p847_p13 = por %p846_p12, %p845_p11 }
  0x3f   :  { %737 = vmatmul.mubr.msk.f32.vlgmr.msra.gmra.mrb[2].mxu0 %vm72_vm1, %v58_v7  ;;  %742 = vmatmul.mubr.msk.f32.vlgmr.msra.gmra.mrb[2].mxu1 %vm72_vm1, %v59_v8  ;;  %v663_v41 = vld [vmem:[#allocation7 + $0xc] sm:$0x3]  ;;  %v664_v42 = vld [vmem:[#allocation7 + $0xe] sm:$0x3] }
  0x40   :  { %744 = vmatprep.subr.mxu0 %v875_v0  ;;  %749 = vmatprep.subr.mxu1 %v875_v0  ;;  %p848_p0 = pnand %p847_p13, %p841_p10 }
  0x41   :  { %745 = vmatpush3.msra.mxu0 %v68_v9  ;;  %750 = vmatpush3.msra.mxu1 %v69_v10 }
  0x42   :  { %746 = vmatprep.mubr.msk.f32.mxu0 %vm876_vm0, %v875_v0  ;;  %751 = vmatprep.mubr.msk.f32.mxu1 %vm876_vm0, %v875_v0 }
  0x43   :  { %747 = vmatmul.mubr.msk.f32.vlgmr.msra.gmra.mrb[4].mxu0 %vm72_vm1, %v60_v11  ;;  %752 = vmatmul.mubr.msk.f32.vlgmr.msra.gmra.mrb[4].mxu1 %vm72_vm1, %v61_v12 }
  0x44   :  { %754 = vmatprep.subr.mxu0 %v875_v0  ;;  %759 = vmatprep.subr.mxu1 %v875_v0 }
  0x45   :  { %755 = vmatpush3.msra.mxu0 %v70_v13  ;;  %760 = vmatpush3.msra.mxu1 %v71_v14 }
  0x46   :  { %756 = vmatprep.mubr.msk.f32.mxu0 %vm876_vm0, %v875_v0  ;;  %761 = vmatprep.mubr.msk.f32.mxu1 %vm876_vm0, %v875_v0 }
  0x47   :  { %757 = vmatmul.mubr.msk.f32.vlgmr.msra.gmra.mrb[6].mxu0 %vm72_vm1, %v62_v15  ;;  %762 = vmatmul.mubr.msk.f32.vlgmr.msra.gmra.mrb[6].mxu1 %vm72_vm1, %v63_v16 }
 0x10e   :  { %v142_v19 = vpop.f32.mrb[0].mxu0  ;;  %v215_v20 = vpop.f32.mrb[0].mxu1 }
 0x10f   :  { %v665_v21 = vmul.f32 %v657_v17, %v142_v19  ;;  %v666_v22 = vmul.f32 %v658_v18, %v215_v20  ;;  %v728_v23 = vpop.f32.mrb[1].mxu0  ;;  %v733_v24 = vpop.f32.mrb[1].mxu1 }
 0x111   :  { %674 = vst.msk [vmem:[#allocation8] sm:$0x3] %vm673_vm2, %v665_v21  ;;  %675 = vst.msk [vmem:[#allocation8 + $0x2] sm:$0x3] %vm673_vm2, %v666_v22 }
 0x112   :  { %v288_v27 = vpop.f32.mrb[2].mxu0  ;;  %v361_v28 = vpop.f32.mrb[2].mxu1 }
 0x113   :  { %v667_v29 = vmul.f32 %v659_v25, %v288_v27  ;;  %v668_v30 = vmul.f32 %v660_v26, %v361_v28  ;;  %v738_v31 = vpop.f32.mrb[3].mxu0  ;;  %v743_v32 = vpop.f32.mrb[3].mxu1 }
 0x115   :  { %676 = vst.msk [vmem:[#allocation8 + $0x4] sm:$0x3] %vm673_vm2, %v667_v29  ;;  %677 = vst.msk [vmem:[#allocation8 + $0x6] sm:$0x3] %vm673_vm2, %v668_v30 }
 0x116   :  { %v434_v35 = vpop.f32.mrb[4].mxu0  ;;  %v507_v36 = vpop.f32.mrb[4].mxu1 }
 0x117   :  { %v669_v37 = vmul.f32 %v661_v33, %v434_v35  ;;  %v670_v38 = vmul.f32 %v662_v34, %v507_v36  ;;  %v748_v39 = vpop.f32.mrb[5].mxu0  ;;  %v753_v40 = vpop.f32.mrb[5].mxu1 }
 0x119   :  { %678 = vst.msk [vmem:[#allocation8 + $0x8] sm:$0x3] %vm673_vm2, %v669_v37  ;;  %679 = vst.msk [vmem:[#allocation8 + $0xa] sm:$0x3] %vm673_vm2, %v670_v38 }
 0x11a   :  { %v580_v43 = vpop.f32.mrb[6].mxu0  ;;  %v653_v44 = vpop.f32.mrb[6].mxu1 }
 0x11b   :  { %v671_v45 = vmul.f32 %v663_v41, %v580_v43  ;;  %v672_v46 = vmul.f32 %v664_v42, %v653_v44  ;;  %v758_v47 = vpop.f32.mrb[7].mxu0  ;;  %v763_v48 = vpop.f32.mrb[7].mxu1 }
 0x11d   :  { %680 = vst.msk [vmem:[#allocation8 + $0xc] sm:$0x3] %vm673_vm2, %v671_v45  ;;  %681 = vst.msk [vmem:[#allocation8 + $0xe] sm:$0x3] %vm673_vm2, %v672_v46 }
 0x11e   :  { %851 = shalt.err (!%p848_p0)
}
 0x11f   :  { %s852_s27 = scalar_lea.hbm %s982_s3, 256 }
 0x120   :  { %p853_p1 = scmp.ne.s32.totalorder %s982_s3, %s852_s27  ;;  %p856_p2 = scmp.lt.u32.totalorder %s852_s27, %s982_s3 }
 0x122   :  { %p858_p3 = pnand %p856_p2, %p853_p1 }
 0x124   :  { %861 = shalt.err (!%p858_p3)
}
 0x125   :  { %693 = dma.vmem_to_hbm [thread:$0]  %s688_s23, 256, %s982_s3, [#allocation4], %s872_s1, %s872_s1, %s873_s9  }
 0x126   :  { %866 = dma.done.wait [#allocation4], 256  }
 0x127   :  { %867 = vsyncadd [#allocation4], 4294967040 }
 0x128   :  { %697 = vsyncpa [#allocation3], 1 }
 0x129   :  { %698 = vsyncpa [#allocation6], 1 }
 0x12a   :  { %699 = vsyncpa [#allocation4], 1 }

</bundles_post_ra>
